<compile_context>
chip_gen: v7x
topology: tpu7x:2x2x1
jax: 0.10.0
libtpu: 0.0.40
codegen_flags: <defaults>
</compile_context>

<pallas_src>
import functools

import jax
import jax.numpy as jnp
from jax.experimental import pallas as pl
from jax.experimental.pallas import tpu as pltpu


def _round_up(n: int, m: int) -> int:
    return (n + m - 1) // m * m


def _fused_mlp_kernel(*refs, n_layers: int):
    """Fused MLP forward: all layers execute in ONE kernel invocation.

    refs = (x_ref, w0_ref, b0_ref, ..., w{L-1}_ref, b{L-1}_ref, o_ref)
      x_ref : (TILE_B, D0)      bf16  batch tile of flattened, padded input
      wi_ref: (D_i, D_{i+1})    bf16  pre-transposed, zero-padded weights
      bi_ref: (1, D_{i+1})      f32   zero-padded bias (broadcast over rows)
      o_ref : (TILE_B, D_L)     f32   padded logits tile

    The running activation never leaves vregs/VMEM between layers.
    """
    x_ref = refs[0]
    o_ref = refs[-1]
    wb_refs = refs[1:-1]

    h = x_ref[...]                                    # bf16 activation
    for i in range(n_layers):                         # unrolled at trace time
        w_ref = wb_refs[2 * i]
        b_ref = wb_refs[2 * i + 1]
        # bf16 x bf16 -> f32 accumulation on the MXU.
        y = jnp.dot(h, w_ref[...], preferred_element_type=jnp.float32)
        y = y + b_ref[...]                            # f32 bias add (row bcast)
        if i < n_layers - 1:
            # Downcast first, ReLU in bf16 (native VPU dtype on v6e/v7x;
            # v5e widens internally -- still correct, same result).
            h = jnp.maximum(y.astype(jnp.bfloat16), 0)
        else:
            o_ref[...] = y.astype(o_ref.dtype)        # lane-dense f32 store


def init_flexmlp_params(key, input_dim, layer_sizes, output_dim=10):
    """nn.Linear-style uniform(-1/sqrt(din), 1/sqrt(din)) init.

    Returns a list of (w_t, b) with w_t of shape (in, out) -- the PyTorch
    (out, in) weight already transposed for the `x @ W` hot path.
    """
    params = []
    dims = [input_dim] + list(layer_sizes) + [output_dim]
    for i in range(len(dims) - 1):
        din, dout = dims[i], dims[i + 1]
        key, kw, kb = jax.random.split(key, 3)
        bound = 1.0 / jnp.sqrt(jnp.float32(din))
        w_t = jax.random.uniform(kw, (din, dout), jnp.float32, -bound, bound)
        b = jax.random.uniform(kb, (1, dout), jnp.float32, -bound, bound)
        params.append((w_t, b))
    return params


def pad_params_for_kernel(params):
    """Zero-pad every (w_t, b) to 128-lane multiples; weights cast to bf16.

    Zero padding guarantees padded output lanes are exactly 0 after bias+ReLU,
    and padded input rows of the next layer contribute 0 -- no leakage.
    Hidden widths are padded only up to 128 (not 256) to avoid dead FLOPs.
    """
    padded = []
    for w_t, b in params:
        din, dout = w_t.shape
        din_p, dout_p = _round_up(din, 128), _round_up(dout, 128)
        w_pad = jnp.zeros((din_p, dout_p), jnp.bfloat16)
        w_pad = w_pad.at[:din, :dout].set(w_t.astype(jnp.bfloat16))
        b_pad = jnp.zeros((1, dout_p), jnp.float32).at[:, :dout].set(b)
        padded.append((w_pad, b_pad))
    return padded


def flexmlp_forward(x, padded_params, output_dim, *, max_tile_b=256):
    """x: (B, ...) -> logits (B, output_dim).  Mirrors x.view(B, -1) + MLP."""
    B = x.shape[0]
    n_layers = len(padded_params)
    din_p = padded_params[0][0].shape[0]
    dout_p = padded_params[-1][0].shape[1]

    # x.view(B, -1), cast straight to bf16 in a single pass (no f32 staging,
    # no full host-side padded copy of the activations).
    x2d = x.reshape(B, -1).astype(jnp.bfloat16)
    din = x2d.shape[1]
    if din != din_p:
        # Feature padding only when the flattened width is not 128-aligned.
        x2d = jnp.pad(x2d, ((0, 0), (0, din_p - din)))

    # Batch tile: up to 256 rows (multiple of 16 -> clean bf16 sublane
    # packing, fills MXU rows).  No batch padding: grid = cdiv(B, tile_b);
    # the ragged last block is read/write-masked by Pallas.  For real batch
    # sizes this also yields >= 2 grid steps so ("parallel",) splits the
    # batch across both v7x TensorCores.
    tile_b = B if B <= max_tile_b else max_tile_b
    grid = (pl.cdiv(B, tile_b),)

    weight_ref_bytes = sum(
        w.size * w.dtype.itemsize + bb.size * bb.dtype.itemsize
        for w, bb in padded_params)

    in_specs = [pl.BlockSpec((tile_b, din_p), lambda i: (i, 0))]
    flat_args = [x2d]
    for w_pad, bias_pad in padded_params:
        # Constant index_map across the grid -> weights/biases stay resident
        # in VMEM; single-buffered so no wasted second DMA buffer.
        in_specs.append(pl.BlockSpec(w_pad.shape, lambda i: (0, 0),
                                     pipeline_mode=pl.Buffered(1)))
        in_specs.append(pl.BlockSpec(bias_pad.shape, lambda i: (0, 0),
                                     pipeline_mode=pl.Buffered(1)))
        flat_args.extend([w_pad, bias_pad])
    out_specs = pl.BlockSpec((tile_b, dout_p), lambda i: (i, 0))

    # Explicit VMEM budget: double-buffered input/output tiles,
    # single-buffered weights, plus slack for the f32 intermediates.
    max_hidden = max(w.shape[1] for w, _ in padded_params)
    vmem_bytes = (2 * tile_b * din_p * 2            # bf16 input tile, x2 bufs
                  + 2 * tile_b * dout_p * 4         # f32 output tile, x2 bufs
                  + weight_ref_bytes                # resident weights/biases
                  + 4 * tile_b * max_hidden)        # f32 accumulator slack
    vmem_limit = int(min(64 << 20, max(vmem_bytes + (4 << 20), 16 << 20)))

    flops = 2 * B * sum(w.shape[0] * w.shape[1] for w, _ in padded_params)
    bytes_accessed = (x2d.size * x2d.dtype.itemsize
                      + weight_ref_bytes
                      + B * dout_p * 4)

    kernel = functools.partial(_fused_mlp_kernel, n_layers=n_layers)
    out_pad = pl.pallas_call(
        kernel,
        out_shape=jax.ShapeDtypeStruct((B, dout_p), jnp.float32),
        grid=grid,
        in_specs=in_specs,
        out_specs=out_specs,
        compiler_params=pltpu.CompilerParams(
            dimension_semantics=("parallel",),      # shard batch over v7x TCs
            vmem_limit_bytes=vmem_limit),
        cost_estimate=pl.CostEstimate(
            flops=flops, transcendentals=0, bytes_accessed=bytes_accessed),
    )(*flat_args)

    # Strip lane padding of the logits (batch is never padded).
    return out_pad[:, :output_dim]


if __name__ == "__main__":
    key = jax.random.PRNGKey(0)
    k_x, k_p = jax.random.split(key)

    # Small deterministic example consistent with the module:
    # NCHW image input, flattened inside forward (x.view(B, -1)).
    B, C, H, W = 2, 4, 16, 16
    input_dim = C * H * W            # 1024 (already 128-aligned -> no pad)
    layer_sizes = [32, 32]
    output_dim = 10

    x = jax.random.normal(k_x, (B, C, H, W), jnp.float32)
    params = init_flexmlp_params(k_p, input_dim, layer_sizes, output_dim)
    padded_params = pad_params_for_kernel(params)

    fwd = jax.jit(functools.partial(flexmlp_forward, output_dim=output_dim))
    out = jax.block_until_ready(fwd(x, padded_params))

    assert out.shape == (B, output_dim)
    assert out.dtype == jnp.float32

    # Loose sanity check against a pure-JAX f32 reference (bf16 matmul inputs
    # introduce small rounding differences vs. the f32 nn.Linear reference).
    h_ref = x.reshape(B, -1)
    for i, (w_t, b) in enumerate(params):
        h_ref = h_ref @ w_t + b
        if i < len(params) - 1:
            h_ref = jnp.maximum(h_ref, 0.0)
    assert jnp.max(jnp.abs(out - h_ref)) < 0.1, "fused kernel mismatch"

    print("KERNEL_OK")
</pallas_src>

<mosaic_0001>
module attributes {stable_mosaic.version = 11 : i64} {
  func.func @_fused_mlp_kernel(%arg0: i32, %arg1: memref<2x1024xbf16, #tpu.memory_space<vmem>>, %arg2: memref<1024x128xbf16, #tpu.memory_space<vmem>>, %arg3: memref<1x128xf32, #tpu.memory_space<vmem>>, %arg4: memref<128x128xbf16, #tpu.memory_space<vmem>>, %arg5: memref<1x128xf32, #tpu.memory_space<vmem>>, %arg6: memref<128x128xbf16, #tpu.memory_space<vmem>>, %arg7: memref<1x128xf32, #tpu.memory_space<vmem>>, %arg8: memref<2x128xf32, #tpu.memory_space<vmem>>) attributes {dimension_semantics = [#tpu.dimension_semantics<parallel>], iteration_bounds = array<i64: 1>, scalar_prefetch = 0 : i64, scratch_operands = 0 : i64, tpu.core_type = #tpu.core_type<tc>, window_params = [{transform_indices = @transform_0, window_bounds = array<i64: 2, 1024>}, {pipeline_mode = #tpu.pipeline_mode<synchronous>, transform_indices = @transform_1, window_bounds = array<i64: 1024, 128>}, {pipeline_mode = #tpu.pipeline_mode<synchronous>, transform_indices = @transform_2, window_bounds = array<i64: 1, 128>}, {pipeline_mode = #tpu.pipeline_mode<synchronous>, transform_indices = @transform_3, window_bounds = array<i64: 128, 128>}, {pipeline_mode = #tpu.pipeline_mode<synchronous>, transform_indices = @transform_4, window_bounds = array<i64: 1, 128>}, {pipeline_mode = #tpu.pipeline_mode<synchronous>, transform_indices = @transform_5, window_bounds = array<i64: 128, 128>}, {pipeline_mode = #tpu.pipeline_mode<synchronous>, transform_indices = @transform_6, window_bounds = array<i64: 1, 128>}, {transform_indices = @transform_7, window_bounds = array<i64: 2, 128>}]} {
    %c0 = arith.constant 0 : index
    %c0_0 = arith.constant 0 : index
    %0 = vector.load %arg1[%c0, %c0_0] : memref<2x1024xbf16, #tpu.memory_space<vmem>>, vector<2x1024xbf16>
    %c0_1 = arith.constant 0 : index
    %c0_2 = arith.constant 0 : index
    %1 = vector.load %arg2[%c0_1, %c0_2] : memref<1024x128xbf16, #tpu.memory_space<vmem>>, vector<1024x128xbf16>
    %cst = arith.constant dense<0.000000e+00> : vector<2x128xf32>
    %2 = tpu.matmul %0, %1, %cst {dimension_numbers = #tpu.dot_dimension_numbers<[1], [0], [0], [1], [0, 0, 1, 1], [], []>} : vector<2x1024xbf16>, vector<1024x128xbf16>, vector<2x128xf32> -> vector<2x128xf32>
    %c0_3 = arith.constant 0 : index
    %c0_4 = arith.constant 0 : index
    %3 = vector.load %arg3[%c0_3, %c0_4] : memref<1x128xf32, #tpu.memory_space<vmem>>, vector<1x128xf32>
    %4 = vector.broadcast %3 : vector<1x128xf32> to vector<2x128xf32>
    %5 = arith.addf %2, %4 : vector<2x128xf32>
    %6 = arith.truncf %5 : vector<2x128xf32> to vector<2x128xbf16>
    %cst_5 = arith.constant 0.000000e+00 : bf16
    %7 = vector.broadcast %cst_5 : bf16 to vector<2x128xbf16>
    %8 = arith.maximumf %6, %7 : vector<2x128xbf16>
    %c0_6 = arith.constant 0 : index
    %c0_7 = arith.constant 0 : index
    %9 = vector.load %arg4[%c0_6, %c0_7] : memref<128x128xbf16, #tpu.memory_space<vmem>>, vector<128x128xbf16>
    %cst_8 = arith.constant dense<0.000000e+00> : vector<2x128xf32>
    %10 = tpu.matmul %8, %9, %cst_8 {dimension_numbers = #tpu.dot_dimension_numbers<[1], [0], [0], [1], [0, 0, 1, 1], [], []>} : vector<2x128xbf16>, vector<128x128xbf16>, vector<2x128xf32> -> vector<2x128xf32>
    %c0_9 = arith.constant 0 : index
    %c0_10 = arith.constant 0 : index
    %11 = vector.load %arg5[%c0_9, %c0_10] : memref<1x128xf32, #tpu.memory_space<vmem>>, vector<1x128xf32>
    %12 = vector.broadcast %11 : vector<1x128xf32> to vector<2x128xf32>
    %13 = arith.addf %10, %12 : vector<2x128xf32>
    %14 = arith.truncf %13 : vector<2x128xf32> to vector<2x128xbf16>
    %cst_11 = arith.constant 0.000000e+00 : bf16
    %15 = vector.broadcast %cst_11 : bf16 to vector<2x128xbf16>
    %16 = arith.maximumf %14, %15 : vector<2x128xbf16>
    %c0_12 = arith.constant 0 : index
    %c0_13 = arith.constant 0 : index
    %17 = vector.load %arg6[%c0_12, %c0_13] : memref<128x128xbf16, #tpu.memory_space<vmem>>, vector<128x128xbf16>
    %cst_14 = arith.constant dense<0.000000e+00> : vector<2x128xf32>
    %18 = tpu.matmul %16, %17, %cst_14 {dimension_numbers = #tpu.dot_dimension_numbers<[1], [0], [0], [1], [0, 0, 1, 1], [], []>} : vector<2x128xbf16>, vector<128x128xbf16>, vector<2x128xf32> -> vector<2x128xf32>
    %c0_15 = arith.constant 0 : index
    %c0_16 = arith.constant 0 : index
    %19 = vector.load %arg7[%c0_15, %c0_16] : memref<1x128xf32, #tpu.memory_space<vmem>>, vector<1x128xf32>
    %20 = vector.broadcast %19 : vector<1x128xf32> to vector<2x128xf32>
    %21 = arith.addf %18, %20 : vector<2x128xf32>
    %c0_17 = arith.constant 0 : index
    %c0_18 = arith.constant 0 : index
    %22 = vector.load %arg8[%c0_17, %c0_18] : memref<2x128xf32, #tpu.memory_space<vmem>>, vector<2x128xf32>
    tpu.vector_store %arg8[%c0_17, %c0_18], %21 {strides = array<i32>} : memref<2x128xf32, #tpu.memory_space<vmem>>, vector<2x128xf32>,
    return
  }
  func.func @transform_0(%arg0: i32) -> (i32, i32) {
    %c0_i32 = arith.constant 0 : i32
    %c0_i32_0 = arith.constant 0 : i32
    return %arg0, %c0_i32 : i32, i32
  }
  func.func @transform_1(%arg0: i32) -> (i32, i32) {
    %c0_i32 = arith.constant 0 : i32
    %c0_i32_0 = arith.constant 0 : i32
    %c0_i32_1 = arith.constant 0 : i32
    return %c0_i32, %c0_i32_0 : i32, i32
  }
  func.func @transform_2(%arg0: i32) -> (i32, i32) {
    %c0_i32 = arith.constant 0 : i32
    %c0_i32_0 = arith.constant 0 : i32
    %c0_i32_1 = arith.constant 0 : i32
    return %c0_i32, %c0_i32_0 : i32, i32
  }
  func.func @transform_3(%arg0: i32) -> (i32, i32) {
    %c0_i32 = arith.constant 0 : i32
    %c0_i32_0 = arith.constant 0 : i32
    %c0_i32_1 = arith.constant 0 : i32
    return %c0_i32, %c0_i32_0 : i32, i32
  }
  func.func @transform_4(%arg0: i32) -> (i32, i32) {
    %c0_i32 = arith.constant 0 : i32
    %c0_i32_0 = arith.constant 0 : i32
    %c0_i32_1 = arith.constant 0 : i32
    return %c0_i32, %c0_i32_0 : i32, i32
  }
  func.func @transform_5(%arg0: i32) -> (i32, i32) {
    %c0_i32 = arith.constant 0 : i32
    %c0_i32_0 = arith.constant 0 : i32
    %c0_i32_1 = arith.constant 0 : i32
    return %c0_i32, %c0_i32_0 : i32, i32
  }
  func.func @transform_6(%arg0: i32) -> (i32, i32) {
    %c0_i32 = arith.constant 0 : i32
    %c0_i32_0 = arith.constant 0 : i32
    %c0_i32_1 = arith.constant 0 : i32
    return %c0_i32, %c0_i32_0 : i32, i32
  }
  func.func @transform_7(%arg0: i32) -> (i32, i32) {
    %c0_i32 = arith.constant 0 : i32
    %c0_i32_0 = arith.constant 0 : i32
    return %arg0, %c0_i32 : i32, i32
  }
}

</mosaic_0001>

<bundles_post_ra>
// kernel: flexmlp_forward.1
= control target key start
LH: loop header
LB: loop body
LE: loop exit
PB: predicated region body
PF: predicated region fallthrough
CT: control target
= control target key end

     0   :  { %12 = vsyncpa [#allocation3], 0  ;;  %s1551_s0 = inlined_call_operand.vmem [shape: bf16[2,1024], index: 0, kind: input, shape index: {}]   ;;  %s1552_s1 = inlined_call_operand.hbm [shape: bf16[1024,128], index: 1, kind: input, shape index: {}]   ;;  %s1553_s2 = inlined_call_operand.vmem [shape: f32[1,128], index: 2, kind: input, shape index: {}]   ;;  %s1554_s3 = inlined_call_operand.vmem [shape: bf16[128,128], index: 3, kind: input, shape index: {}]   ;;  %s1555_s4 = inlined_call_operand.vmem [shape: f32[1,128], index: 4, kind: input, shape index: {}]   ;;  %s1556_s5 = inlined_call_operand.vmem [shape: bf16[128,128], index: 5, kind: input, shape index: {}]   ;;  %s1557_s6 = inlined_call_operand.vmem [shape: f32[1,128], index: 6, kind: input, shape index: {}]   ;;  %s1558_s7 = inlined_call_operand.hbm [shape: f32[2,128], index: 7, kind: output, shape index: {}]  }
   0x1   :  { %13 = vsyncpa [#allocation4], 0  ;;  %s1388_s24 = smov [#allocation2]   ;;  %s1340_s28 = scalar_lea.hbm %s1552_s1, 8192 }
   0x2   :  { %s21_s25 = sshll.u32 %s1388_s24, 4  ;;  %p1341_p0 = scmp.ne.s32.totalorder %s1552_s1, %s1340_s28  ;;  %s22_s25 = int_to_ptr.vmem [resolvable:$true] %s21_s25 }
   0x3   :  { %p1344_p1 = scmp.lt.u32.totalorder %s1340_s28, %s1552_s1 }
   0x5   :  { %p1346_p2 = pnand %p1344_p1, %p1341_p0 }
   0x7   :  { %1349 = shalt.err (!%p1346_p2)
}
   0x8   :  { %s1350_s10 = scalar_lea.vmem %s22_s25, 8192  ;;  %p1355_p4 = scmp.lt.s32.totalorder %s22_s25, %s22_s25 }
   0x9   :  { %p1351_p3 = scmp.ne.s32.totalorder %s22_s25, %s1350_s10  ;;  %p1356_p5 = scmp.lt.s32.totalorder %s1350_s10, %s1350_s10 }
   0xb   :  { %p1357_p6 = por %p1356_p5, %p1355_p4 }
   0xd   :  { %p1358_p7 = pnand %p1357_p6, %p1351_p3 }
   0xf   :  { %1361 = shalt.err (!%p1358_p7)
}
  0x10   :  { %s1389_s11 = smov 64   ;;  %s1390_s12 = smov 4  }
  0x11   :  { %27 = dma.hbm_to_vmem [thread:$0]  %s1552_s1, 8192, %s22_s25, [#allocation3], %s1389_s11, %s1389_s11, %s1390_s12  }
  0x12   :  { %1384 = dma.done.wait [#allocation3], 8192  }
  0x13   :  { %1385 = vsyncadd [#allocation3], 4294959104  ;;  %v1259_v0 = vld [vmem:[#allocation2 + $0x40] sm:$0xff]   ;;  %v1263_v4 = vld [vmem:[#allocation2 + $0x48] sm:$0xff]   ;;  %v1391_v22 = vmov 1966171168   ;;  %v183_v24 = vlaneseq }
  0x14   :  { %v1260_v1 = vld [vmem:[#allocation2 + $0xc0] sm:$0xff]   ;;  %1105 = vmatprep.subr.bf16.mxu0 %v1259_v0  ;;  %v1264_v5 = vld [vmem:[#allocation2 + $0xc8] sm:$0xff]   ;;  %v1267_v8 = vld [vmem:[#allocation2 + $0x50] sm:$0xff]   ;;  %v181_v23 = vunpack.c.l.s4 %v1391_v22  ;;  %vm1393_vm0 = vmmov 0   ;;  %s1395_s26 = smov [#allocation5]  }
  0x15   :  { %v1261_v2 = vld [vmem:[#allocation2] sm:$0xff]   ;;  %1127 = vmatprep.subr.bf16.mxu1 %v1260_v1  ;;  %v1265_v6 = vld [vmem:[#allocation2 + $0x8] sm:$0xff]   ;;  %v1268_v9 = vld [vmem:[#allocation2 + $0xd0] sm:$0xff]   ;;  %v184_v30 = vshrl.u32 %v183_v24, 7  ;;  %s1013_s27 = sshll.u32 %s1395_s26, 4  ;;  %s1014_s27 = int_to_ptr.vmem [resolvable:$true] %s1013_s27 }
  0x16   :  { %v1262_v3 = vld [vmem:[#allocation2 + $0x80] sm:$0xff]   ;;  %1106 = vmatpush3.bf16.msra.mxu0 %v1261_v2  ;;  %v1266_v7 = vld [vmem:[#allocation2 + $0x88] sm:$0xff]   ;;  %v1269_v10 = vld [vmem:[#allocation2 + $0x10] sm:$0xff]   ;;  %v182_v29 = vunpack.c.0.s8 %v181_v23  ;;  %p1367_p9 = scmp.lt.s32.totalorder %s1014_s27, %s1014_s27 }
  0x17   :  { %1128 = vmatpush3.bf16.msra.mxu1 %v1262_v3  ;;  %1107 = vmatprep.subr.bf16.mxu0 %v1263_v4  ;;  %v1270_v11 = vld [vmem:[#allocation2 + $0x90] sm:$0xff]   ;;  %v1271_v12 = vld [vmem:[#allocation2 + $0x58] sm:$0xff]   ;;  %v1275_v16 = vld [vmem:[#allocation2 + $0x60] sm:$0xff]  }
  0x18   :  { %1129 = vmatprep.subr.bf16.mxu1 %v1264_v5  ;;  %v1272_v13 = vld [vmem:[#allocation2 + $0xd8] sm:$0xff]   ;;  %v1276_v17 = vld [vmem:[#allocation2 + $0xe0] sm:$0xff]   ;;  %v1279_v20 = vld [vmem:[#allocation2 + $0x68] sm:$0xff]   ;;  %v1448_v35 = vsub.s32 %v182_v29, %v184_v30 }
  0x19   :  { %v1273_v14 = vld [vmem:[#allocation2 + $0x18] sm:$0xff]   ;;  %v1277_v18 = vld [vmem:[#allocation2 + $0x20] sm:$0xff]   ;;  %v1280_v21 = vld [vmem:[#allocation2 + $0xe8] sm:$0xff]  }
  0x1a   :  { %1108 = vmatpush3.bf16.msra.mxu0 %v1265_v6  ;;  %v1274_v15 = vld [vmem:[#allocation2 + $0x98] sm:$0xff]   ;;  %v1278_v19 = vld [vmem:[#allocation2 + $0xa0] sm:$0xff]   ;;  %v1281_v25 = vld [vmem:[#allocation2 + $0x28] sm:$0xff]  }
  0x1b   :  { %1130 = vmatpush3.bf16.msra.mxu1 %v1266_v7  ;;  %1109 = vmatprep.subr.bf16.mxu0 %v1267_v8  ;;  %v1282_v26 = vld [vmem:[#allocation2 + $0xa8] sm:$0xff]   ;;  %v1283_v27 = vld [vmem:[#allocation2 + $0x70] sm:$0xff]   ;;  %v1287_v33 = vld [vmem:[#allocation2 + $0x78] sm:$0xff]  }
  0x1c   :  { %1131 = vmatprep.subr.bf16.mxu1 %v1268_v9  ;;  %v1284_v28 = vld [vmem:[#allocation2 + $0xf0] sm:$0xff]   ;;  %v1288_v34 = vld [vmem:[#allocation2 + $0xf8] sm:$0xff]   ;;  %v42_v38 = vld [vmem:[%s1551_s0] sm:$0xff] }
  0x1d   :  { %v1285_v31 = vld [vmem:[#allocation2 + $0x30] sm:$0xff]   ;;  %v1289_v36 = vld [vmem:[#allocation2 + $0x38] sm:$0xff]   ;;  %v179_v39 = vcombine.high %v42_v38, %v42_v38  ;;  %v186_v40 = vrot.slane %v42_v38, %v1448_v35  ;;  %v1292_v41 = vld [vmem:[#allocation2 + $0x140] sm:$0xff]  }
  0x1e   :  { %1110 = vmatpush3.bf16.msra.mxu0 %v1269_v10  ;;  %v1286_v32 = vld [vmem:[#allocation2 + $0xb0] sm:$0xff]   ;;  %v1290_v37 = vld [vmem:[#allocation2 + $0xb8] sm:$0xff]   ;;  %v1293_v42 = vld [vmem:[#allocation2 + $0x1c0] sm:$0xff]  }
  0x1f   :  { %1132 = vmatpush3.bf16.msra.mxu1 %v1270_v11  ;;  %1111 = vmatprep.subr.bf16.mxu0 %v1271_v12  ;;  %v194_v43 = vcombine.high %v186_v40, %v186_v40  ;;  %v202_v44 = vrot.slane %v186_v40, %v1448_v35  ;;  %v1456_v45 = vrot.slane %v179_v39, %v1448_v35  ;;  %v1294_v46 = vld [vmem:[#allocation2 + $0x100] sm:$0xff]   ;;  %v1296_v51 = vld [vmem:[#allocation2 + $0x148] sm:$0xff]   ;;  %v1300_v58 = vld [vmem:[#allocation2 + $0x150] sm:$0xff]  }
  0x20   :  { %1133 = vmatprep.subr.bf16.mxu1 %v1272_v13  ;;  %v1295_v48 = vld [vmem:[#allocation2 + $0x180] sm:$0xff]   ;;  %v1297_v53 = vld [vmem:[#allocation2 + $0x1c8] sm:$0xff]   ;;  %v1301_v59 = vld [vmem:[#allocation2 + $0x1d0] sm:$0xff]  }
  0x21   :  { %v216_v47 = vrot.slane %v194_v43, %v1448_v35  ;;  %v195_v49 = vcombine.high %v1456_v45, %v1456_v45  ;;  %v224_v50 = vcombine.high %v202_v44, %v202_v44  ;;  %v1298_v55 = vld [vmem:[#allocation2 + $0x108] sm:$0xff]   ;;  %v1302_v60 = vld [vmem:[#allocation2 + $0x110] sm:$0xff]   ;;  %v1304_v62 = vld [vmem:[#allocation2 + $0x158] sm:$0xff]  }
  0x22   :  { %1112 = vmatpush3.bf16.msra.mxu0 %v1273_v14  ;;  %v1299_v56 = vld [vmem:[#allocation2 + $0x188] sm:$0xff]   ;;  %v1303_v61 = vld [vmem:[#allocation2 + $0x190] sm:$0xff]   ;;  %v1305_v63 = vld [vmem:[#allocation2 + $0x1d8] sm:$0xff]  }
  0x23   :  { %1134 = vmatpush3.bf16.msra.mxu1 %v1274_v15  ;;  %1113 = vmatprep.subr.bf16.mxu0 %v1275_v16  ;;  %v226_v52 = vcombine.high %v216_v47, %v216_v47  ;;  %v223_v54 = vrot.slane %v195_v49, %v1448_v35  ;;  %v1306_v0 = vld [vmem:[#allocation2 + $0x118] sm:$0xff]   ;;  %v1308_v2 = vld [vmem:[#allocation2 + $0x160] sm:$0xff]   ;;  %v1312_v6 = vld [vmem:[#allocation2 + $0x168] sm:$0xff]  }
  0x24   :  { %1135 = vmatprep.subr.bf16.mxu1 %v1276_v17  ;;  %652 = vmatprep.mubr.bf16.mxu0 %v216_v47  ;;  %v1307_v1 = vld [vmem:[#allocation2 + $0x198] sm:$0xff]   ;;  %v1309_v3 = vld [vmem:[#allocation2 + $0x1e0] sm:$0xff]   ;;  %v1313_v7 = vld [vmem:[#allocation2 + $0x1e8] sm:$0xff]  }
  0x25   :  { %692 = vmatprep.mubr.bf16.mxu1 %v226_v52  ;;  %v227_v57 = vcombine.high %v223_v54, %v223_v54  ;;  %v1310_v4 = vld [vmem:[#allocation2 + $0x120] sm:$0xff]   ;;  %v1314_v8 = vld [vmem:[#allocation2 + $0x128] sm:$0xff]   ;;  %v1316_v10 = vld [vmem:[#allocation2 + $0x170] sm:$0xff]  }
  0x26   :  { %1114 = vmatpush3.bf16.msra.mxu0 %v1277_v18  ;;  %v1311_v5 = vld [vmem:[#allocation2 + $0x1a0] sm:$0xff]   ;;  %v1315_v9 = vld [vmem:[#allocation2 + $0x1a8] sm:$0xff]   ;;  %v1317_v11 = vld [vmem:[#allocation2 + $0x1f0] sm:$0xff]   ;;  %v209_v18 = vrot.slane %v1456_v45, %v1448_v35 }
  0x27   :  { %1136 = vmatpush3.bf16.msra.mxu1 %v1278_v19  ;;  %1115 = vmatprep.subr.bf16.mxu0 %v1279_v20  ;;  %v1318_v12 = vld [vmem:[#allocation2 + $0x130] sm:$0xff]   ;;  %v1320_v14 = vld [vmem:[#allocation2 + $0x178] sm:$0xff]   ;;  %v1324_v20 = vld [vmem:[%s1554_s3] sm:$0xff]  }
  0x28   :  { %1137 = vmatprep.subr.bf16.mxu1 %v1280_v21  ;;  %v1319_v13 = vld [vmem:[#allocation2 + $0x1b0] sm:$0xff]   ;;  %v1321_v15 = vld [vmem:[#allocation2 + $0x1f8] sm:$0xff]   ;;  %v225_v19 = vcombine.high %v209_v18, %v209_v18  ;;  %v1392_v21 = vmov 0.0   ;;  %v1325_v22 = vld [vmem:[%s1554_s3 + $0x8] sm:$0xff]  }
  0x29   :  { %v1322_v16 = vld [vmem:[#allocation2 + $0x138] sm:$0xff]   ;;  %v1326_v23 = vld [vmem:[%s1554_s3 + $0x10] sm:$0xff]   ;;  %v1332_v29 = vld [vmem:[%s1556_s5] sm:$0xff]  }
  0x2a   :  { %1116 = vmatpush3.bf16.msra.mxu0 %v1281_v25  ;;  %v1323_v17 = vld [vmem:[#allocation2 + $0x1b8] sm:$0xff]   ;;  %v1328_v25 = vld [vmem:[%s1554_s3 + $0x20] sm:$0xff]   ;;  %v1333_v30 = vld [vmem:[%s1556_s5 + $0x8] sm:$0xff]  }
  0x2b   :  { %1138 = vmatpush3.bf16.msra.mxu1 %v1282_v26  ;;  %1117 = vmatprep.subr.bf16.mxu0 %v1283_v27  ;;  %v1327_v24 = vld [vmem:[%s1554_s3 + $0x18] sm:$0xff]   ;;  %v1329_v26 = vld [vmem:[%s1554_s3 + $0x28] sm:$0xff]   ;;  %v1330_v27 = vld [vmem:[%s1554_s3 + $0x30] sm:$0xff]  }
  0x2c   :  { %1139 = vmatprep.subr.bf16.mxu1 %v1284_v28  ;;  %v1331_v28 = vld [vmem:[%s1554_s3 + $0x38] sm:$0xff]  }
  0x2e   :  { %1118 = vmatpush3.bf16.msra.mxu0 %v1285_v31  ;;  %v1334_v31 = vld [vmem:[%s1556_s5 + $0x10] sm:$0xff]  }
  0x2f   :  { %1140 = vmatpush3.bf16.msra.mxu1 %v1286_v32  ;;  %1119 = vmatprep.subr.bf16.mxu0 %v1287_v33  ;;  %v1335_v32 = vld [vmem:[%s1556_s5 + $0x18] sm:$0xff]   ;;  %v1336_v33 = vld [vmem:[%s1556_s5 + $0x20] sm:$0xff]  }
  0x30   :  { %1141 = vmatprep.subr.bf16.mxu1 %v1288_v34  ;;  %v1337_v34 = vld [vmem:[%s1556_s5 + $0x28] sm:$0xff]  }
  0x32   :  { %1120 = vmatpush3.bf16.msra.mxu0 %v1289_v36  ;;  %v1022_v36 = vld [vmem:[%s1553_s2] ss:$0 sm:$0xff] }
  0x33   :  { %1142 = vmatpush3.bf16.msra.mxu1 %v1290_v37  ;;  %1149 = vmatprep.subr.bf16.mxu0 %v1292_v41 }
  0x34   :  { %1171 = vmatprep.subr.bf16.mxu1 %v1293_v42 }
  0x35   :  { %653 = vmatmul.mubr.bf16.vlgmr.msra.gmra.mrb[0].mxu0 %v202_v44 }
  0x36   :  { %1150 = vmatpush3.bf16.msra.mxu0 %v1294_v46  ;;  %693 = vmatmul.mubr.bf16.vlgmr.msra.gmra.mrb[0].mxu1 %v224_v50 }
  0x37   :  { %1151 = vmatprep.subr.bf16.mxu0 %v1296_v51  ;;  %1172 = vmatpush3.bf16.msra.mxu1 %v1295_v48 }
  0x38   :  { %732 = vmatprep.mubr.bf16.mxu0 %v223_v54  ;;  %1173 = vmatprep.subr.bf16.mxu1 %v1297_v53 }
  0x39   :  { %772 = vmatprep.mubr.bf16.mxu1 %v227_v57 }
  0x3a   :  { %1152 = vmatpush3.bf16.msra.mxu0 %v1298_v55 }
  0x3b   :  { %1153 = vmatprep.subr.bf16.mxu0 %v1300_v58  ;;  %1174 = vmatpush3.bf16.msra.mxu1 %v1299_v56 }
  0x3c   :  { %1175 = vmatprep.subr.bf16.mxu1 %v1301_v59 }
  0x3e   :  { %1154 = vmatpush3.bf16.msra.mxu0 %v1302_v60 }
  0x3f   :  { %1155 = vmatprep.subr.bf16.mxu0 %v1304_v62  ;;  %1176 = vmatpush3.bf16.msra.mxu1 %v1303_v61  ;;  %v1394_v61 = vmov 0  }
  0x40   :  { %1177 = vmatprep.subr.bf16.mxu1 %v1305_v63  ;;  %v1338_v63 = vld [vmem:[%s1556_s5 + $0x30] sm:$0xff]  }
  0x42   :  { %1156 = vmatpush3.bf16.msra.mxu0 %v1306_v0  ;;  %v1339_v0 = vld [vmem:[%s1556_s5 + $0x38] sm:$0xff]  }
  0x43   :  { %1157 = vmatprep.subr.bf16.mxu0 %v1308_v2  ;;  %1178 = vmatpush3.bf16.msra.mxu1 %v1307_v1  ;;  %v1087_v1 = vld [vmem:[%s1555_s4] ss:$0 sm:$0xff]  ;;  %s1362_s4 = scalar_lea.vmem %s1014_s27, 32 }
  0x44   :  { %1179 = vmatprep.subr.bf16.mxu1 %v1309_v3  ;;  %p1363_p8 = scmp.ne.s32.totalorder %s1014_s27, %s1362_s4  ;;  %p1368_p10 = scmp.lt.s32.totalorder %s1362_s4, %s1362_s4 }
  0x46   :  { %1158 = vmatpush3.bf16.msra.mxu0 %v1310_v4  ;;  %p1369_p11 = por %p1368_p10, %p1367_p9 }
  0x47   :  { %1159 = vmatprep.subr.bf16.mxu0 %v1312_v6  ;;  %1180 = vmatpush3.bf16.msra.mxu1 %v1311_v5 }
  0x48   :  { %1181 = vmatprep.subr.bf16.mxu1 %v1313_v7  ;;  %p1370_p12 = pnand %p1369_p11, %p1363_p8 }
  0x4a   :  { %1160 = vmatpush3.bf16.msra.mxu0 %v1314_v8 }
  0x4b   :  { %1161 = vmatprep.subr.bf16.mxu0 %v1316_v10  ;;  %1182 = vmatpush3.bf16.msra.mxu1 %v1315_v9  ;;  %v1096_v9 = vld [vmem:[%s1557_s6] ss:$0 sm:$0xff] }
  0x4c   :  { %1183 = vmatprep.subr.bf16.mxu1 %v1317_v11 }
  0x4e   :  { %1162 = vmatpush3.bf16.msra.mxu0 %v1318_v12 }
  0x4f   :  { %1163 = vmatprep.subr.bf16.mxu0 %v1320_v14  ;;  %1184 = vmatpush3.bf16.msra.mxu1 %v1319_v13 }
  0x50   :  { %1185 = vmatprep.subr.bf16.mxu1 %v1321_v15 }
  0x52   :  { %1164 = vmatpush3.bf16.msra.mxu0 %v1322_v16 }
  0x53   :  { %1186 = vmatpush3.bf16.msra.mxu1 %v1323_v17  ;;  %1211 = vmatprep.subr.bf16.mxu0 %v1392_v21 }
  0x54   :  { %1231 = vmatprep.subr.bf16.mxu1 %v1392_v21 }
  0x55   :  { %733 = vmatmul.mubr.bf16.vlgmr.msra.gmra.mrb[4].mxu0 %v209_v18 }
  0x56   :  { %773 = vmatmul.mubr.bf16.vlgmr.msra.gmra.mrb[4].mxu1 %v225_v19  ;;  %1212 = vmatpush3.bf16.msra.mxu0 %v1324_v20 }
  0x57   :  { %1213 = vmatprep.subr.bf16.mxu0 %v1392_v21  ;;  %1227 = vmatprep.mubr.msk.bf16.mxu0 %vm1393_vm0, %v1392_v21 }
  0x58   :  { %1247 = vmatprep.mubr.msk.bf16.mxu1 %vm1393_vm0, %v1392_v21  ;;  %1232 = vmatpush3.bf16.msra.mxu1 %v1332_v29 }
  0x59   :  { %1233 = vmatprep.subr.bf16.mxu1 %v1392_v21 }
  0x5a   :  { %1214 = vmatpush3.bf16.msra.mxu0 %v1325_v22 }
  0x5b   :  { %1215 = vmatprep.subr.bf16.mxu0 %v1392_v21 }
  0x5c   :  { %1234 = vmatpush3.bf16.msra.mxu1 %v1333_v30 }
  0x5d   :  { %1235 = vmatprep.subr.bf16.mxu1 %v1392_v21 }
  0x5e   :  { %1216 = vmatpush3.bf16.msra.mxu0 %v1326_v23 }
  0x5f   :  { %1217 = vmatprep.subr.bf16.mxu0 %v1392_v21 }
  0x60   :  { %1236 = vmatpush3.bf16.msra.mxu1 %v1334_v31 }
  0x61   :  { %1237 = vmatprep.subr.bf16.mxu1 %v1392_v21 }
  0x62   :  { %1218 = vmatpush3.bf16.msra.mxu0 %v1327_v24 }
  0x63   :  { %1219 = vmatprep.subr.bf16.mxu0 %v1392_v21 }
  0x64   :  { %1238 = vmatpush3.bf16.msra.mxu1 %v1335_v32 }
  0x65   :  { %1239 = vmatprep.subr.bf16.mxu1 %v1392_v21 }
  0x66   :  { %1220 = vmatpush3.bf16.msra.mxu0 %v1328_v25 }
  0x67   :  { %1221 = vmatprep.subr.bf16.mxu0 %v1392_v21 }
  0x68   :  { %1240 = vmatpush3.bf16.msra.mxu1 %v1336_v33 }
  0x69   :  { %1241 = vmatprep.subr.bf16.mxu1 %v1392_v21 }
  0x6a   :  { %1222 = vmatpush3.bf16.msra.mxu0 %v1329_v26 }
  0x6b   :  { %1223 = vmatprep.subr.bf16.mxu0 %v1392_v21 }
  0x6c   :  { %1242 = vmatpush3.bf16.msra.mxu1 %v1337_v34 }
  0x6d   :  { %1243 = vmatprep.subr.bf16.mxu1 %v1392_v21 }
  0x6e   :  { %1224 = vmatpush3.bf16.msra.mxu0 %v1330_v27 }
  0x6f   :  { %1225 = vmatprep.subr.bf16.mxu0 %v1392_v21 }
  0x70   :  { %1244 = vmatpush3.bf16.msra.mxu1 %v1338_v63 }
  0x71   :  { %1245 = vmatprep.subr.bf16.mxu1 %v1392_v21 }
  0x72   :  { %1226 = vmatpush3.bf16.msra.mxu0 %v1331_v28 }
  0x74   :  { %1246 = vmatpush3.bf16.msra.mxu1 %v1339_v0 }
 0x108   :  { %v1121_v35 = vpop.f32.mrb[0].mxu0 }
 0x109   :  { %v1122_v37 = vpop.f32.mrb[1].mxu0  ;;  %v1143_v38 = vpop.f32.mrb[0].mxu1 }
 0x10a   :  { %v1123_v39 = vadd.f32 %v1122_v37, %v1121_v35  ;;  %v1124_v40 = vpop.f32.mrb[2].mxu0  ;;  %v1144_v41 = vpop.f32.mrb[1].mxu1 }
 0x10b   :  { %v1125_v42 = vpop.f32.mrb[3].mxu0  ;;  %v1145_v44 = vadd.f32 %v1144_v41, %v1143_v38  ;;  %v1146_v45 = vpop.f32.mrb[2].mxu1 }
 0x10c   :  { %v655_v43 = vadd.f32 %v1123_v39, %v1022_v36  ;;  %v1147_v46 = vpop.f32.mrb[3].mxu1 }
 0x10e   :  { %v695_v47 = vadd.f32 %v1145_v44, %v655_v43 }
 0x128   :  { %v1165_v48 = vpop.f32.mrb[4].mxu0 }
 0x129   :  { %v1166_v49 = vpop.f32.mrb[5].mxu0  ;;  %v1187_v50 = vpop.f32.mrb[4].mxu1 }
 0x12a   :  { %v1167_v51 = vadd.f32 %v1166_v49, %v1165_v48  ;;  %v1168_v52 = vpop.f32.mrb[6].mxu0  ;;  %v1188_v53 = vpop.f32.mrb[5].mxu1 }
 0x12b   :  { %v1169_v54 = vpop.f32.mrb[7].mxu0  ;;  %v1189_v56 = vadd.f32 %v1188_v53, %v1187_v50  ;;  %v1190_v57 = vpop.f32.mrb[6].mxu1 }
 0x12c   :  { %v735_v55 = vadd.f32 %v1167_v51, %v695_v47  ;;  %v1191_v58 = vpop.f32.mrb[7].mxu1 }
 0x12e   :  { %v775_v59 = vadd.f32 %v1189_v56, %v735_v55 }
 0x130   :  { %v780_v60 = vpack.c.bf16 %v775_v59, %v775_v59 }
 0x132   :  { %v781_v62 = vmax.bf16 %v1394_v61, %v780_v60 }
 0x134   :  { %1228 = vmatmul.mubr.bf16.vlgmr.msra.gmra.mrb[8].mxu0 %v781_v62 }
 0x207   :  { %v887_v2 = vpop.f32.mrb[8].mxu0 }
 0x208   :  { %v888_v3 = vadd.f32 %v1087_v1, %v887_v2  ;;  %v1229_v4 = vpop.f32.mrb[9].mxu0 }
 0x209   :  { %v890_v5 = vpop.f32.mrb[10].mxu0 }
 0x20a   :  { %v893_v6 = vpack.c.bf16 %v888_v3, %v888_v3  ;;  %v1230_v7 = vpop.f32.mrb[11].mxu0 }
 0x20c   :  { %v894_v8 = vmax.bf16 %v1394_v61, %v893_v6 }
 0x20e   :  { %1248 = vmatmul.mubr.bf16.vlgmr.msra.gmra.mrb[8].mxu1 %v894_v8 }
 0x2e1   :  { %v1000_v10 = vpop.f32.mrb[8].mxu1 }
 0x2e2   :  { %v1001_v11 = vadd.f32 %v1096_v9, %v1000_v10  ;;  %v1249_v12 = vpop.f32.mrb[9].mxu1 }
 0x2e3   :  { %v1003_v13 = vpop.f32.mrb[10].mxu1 }
 0x2e4   :  { %1006 = vst [vmem:[#allocation5] sm:$0x3] %v1001_v11  ;;  %v1250_v14 = vpop.f32.mrb[11].mxu1 }
 0x2e5   :  { %1373 = shalt.err (!%p1370_p12)
}
 0x2e6   :  { %s1374_s6 = scalar_lea.hbm %s1558_s7, 32 }
 0x2e7   :  { %p1375_p13 = scmp.ne.s32.totalorder %s1558_s7, %s1374_s6  ;;  %p1378_p0 = scmp.lt.u32.totalorder %s1374_s6, %s1558_s7 }
 0x2e9   :  { %p1380_p1 = pnand %p1378_p0, %p1375_p13 }
 0x2eb   :  { %1383 = shalt.err (!%p1380_p1)
}
 0x2ec   :  { %1016 = dma.vmem_to_hbm [thread:$0]  %s1014_s27, 32, %s1558_s7, [#allocation4]  }
 0x2ed   :  { %1386 = dma.done.wait [#allocation4], 32  }
 0x2ee   :  { %1387 = vsyncadd [#allocation4], 4294967264 }
 0x2ef   :  { %1020 = vsyncpa [#allocation3], 1 }
 0x2f0   :  { %1021 = vsyncpa [#allocation4], 1 }

</bundles_post_ra>
